<compile_context>
chip_gen: v7x
topology: tpu7x:2x2x1
jax: 0.10.0
libtpu: 0.0.40
codegen_flags: <defaults>
</compile_context>

<pallas_src>
import jax
import jax.numpy as jnp
from jax.experimental import pallas as pl
from jax.experimental.pallas import tpu as pltpu

_LANE = 128


def _spectral_mix_kernel(ar_ref, ai_ref, wr_ref, wi_ref, or_ref, oi_ref):
    # Blocks: a_* (B, Cin, S, 128), w_* (Cin, Cout, S, 128), out (B, Cout, S, 128).
    # The mode axis occupies the (sublane, lane) pair, so vreg occupancy does
    # not depend on B / Cin / Cout.
    ar = ar_ref[...].astype(jnp.float32)
    ai = ai_ref[...].astype(jnp.float32)
    wr = wr_ref[...].astype(jnp.float32)   # upcast is a no-op for f32 weights
    wi = wi_ref[...].astype(jnp.float32)

    cin = ar.shape[1]
    acc_r = None
    acc_i = None
    # Single fused pass over Cin (unrolled: Cin is small and static).  Each
    # a[:, i] / w[i] pair is loaded once and reused for the real and imaginary
    # accumulators — no (B, Cin, Cout, modes) broadcast temporaries.
    for i in range(cin):
        ar_i = ar[:, i][:, None]          # (B, 1, S, 128)
        ai_i = ai[:, i][:, None]
        wr_i = wr[i][None]                # (1, Cout, S, 128)
        wi_i = wi[i][None]
        pr = ar_i * wr_i - ai_i * wi_i    # (B, Cout, S, 128)
        pi = ar_i * wi_i + ai_i * wr_i
        acc_r = pr if acc_r is None else acc_r + pr
        acc_i = pi if acc_i is None else acc_i + pi

    or_ref[...] = acc_r
    oi_ref[...] = acc_i


def _vmem_budget_and_limit():
    """Generation-aware VMEM working-set budget + scoped limit (bytes)."""
    cap = 64 << 20                       # conservative default (v7x per-TC VMEM)
    try:
        cap = int(pltpu.get_tpu_info().vmem_capacity_bytes)
    except Exception:                    # pragma: no cover - query best effort
        pass
    # ~1/5 of physical VMEM for the pipelined working set, capped at 24 MiB
    # (v5e/v6e: 128 MiB -> 24 MiB; v7x: 64 MiB -> ~12.8 MiB).
    budget = max(6 << 20, min(24 << 20, cap // 5))
    limit = int(min(cap // 2, budget + (8 << 20)))
    return budget, limit


def _choose_mode_tiling(n_modes, batch, cin, cout, budget_bytes):
    """Pick (s_tile, s_total): mode-axis tiling in units of 128-lane rows.

    s_tile = sublane rows of the mode axis per grid step (lanes = 128*s_tile);
    s_total >= ceil(n_modes/128) is padded so that s_tile divides it.
    """
    s_needed = pl.cdiv(n_modes, _LANE)

    if s_needed <= 8:
        # Tiny mode counts: a single step whose block equals the full array
        # (satisfies the (8,128) rule via the "equal to full dim" escape).
        return s_needed, s_needed

    # f32 bytes per 128-lane mode row resident in VMEM:
    # double-buffered a_re/a_im, w_re/w_im, out_re/out_im blocks.
    per_row = 4 * _LANE * (2 * 2 * batch * cin
                           + 2 * 2 * cin * cout
                           + 2 * 2 * batch * cout)
    max_rows_budget = max(1, budget_bytes // per_row)

    s_tile = max(4, pl.cdiv(s_needed, 4))          # aim for >= ~4 grid steps
    s_tile = min(s_tile, 16, max_rows_budget)      # <= 2048 lanes & VMEM budget
    s_tile = max(8, (s_tile // 8) * 8)             # full 8-sublane vregs
    s_total = pl.cdiv(s_needed, s_tile) * s_tile
    return s_tile, s_total


def spectral_channel_mix(a_re, a_im, w_re, w_im):
    """Per-Fourier-mode complex channel mixing on the VPU.

    a_*: (B, Cin, M) float32, w_*: (Cin, Cout, M) float32/bfloat16.
    Returns (out_re, out_im), each (B, Cout, M) float32, where for every
    mode m:  out[:, :, m] = a[:, :, m] @ w[:, :, m]  as a complex product.
    """
    B, Cin, M = a_re.shape
    Cout = w_re.shape[1]

    budget, vmem_limit = _vmem_budget_and_limit()
    s_tile, s_total = _choose_mode_tiling(M, B, Cin, Cout, budget)
    m_pad = s_total * _LANE

    def prep(x):  # zero-pad mode axis to the tile multiple, fold to (.., S, 128)
        x = jnp.pad(x, ((0, 0), (0, 0), (0, m_pad - x.shape[-1])))
        return x.reshape(x.shape[0], x.shape[1], s_total, _LANE)

    a_re4, a_im4 = prep(a_re), prep(a_im)
    w_re4, w_im4 = prep(w_re), prep(w_im)

    a_spec = pl.BlockSpec((B, Cin, s_tile, _LANE), lambda m: (0, 0, m, 0))
    w_spec = pl.BlockSpec((Cin, Cout, s_tile, _LANE), lambda m: (0, 0, m, 0))
    o_spec = pl.BlockSpec((B, Cout, s_tile, _LANE), lambda m: (0, 0, m, 0))

    out_re, out_im = pl.pallas_call(
        _spectral_mix_kernel,
        out_shape=(jax.ShapeDtypeStruct((B, Cout, s_total, _LANE), jnp.float32),
                   jax.ShapeDtypeStruct((B, Cout, s_total, _LANE), jnp.float32)),
        grid_spec=pltpu.PrefetchScalarGridSpec(
            num_scalar_prefetch=0,
            grid=(s_total // s_tile,),
            in_specs=[a_spec, a_spec, w_spec, w_spec],
            out_specs=[o_spec, o_spec]),
        compiler_params=pltpu.CompilerParams(
            dimension_semantics=(pltpu.PARALLEL,),
            vmem_limit_bytes=vmem_limit),
    )(a_re4, a_im4, w_re4, w_im4)

    out_re = out_re.reshape(B, Cout, m_pad)[:, :, :M]
    out_im = out_im.reshape(B, Cout, m_pad)[:, :, :M]
    return out_re, out_im


class SpectralConv2d:
    """JAX/Pallas port of the PyTorch SpectralConv2d (uniform-grid path)."""

    def __init__(self, in_channels, out_channels, modes1, modes2, s1=32, s2=32,
                 key=jax.random.PRNGKey(0), weight_dtype=jnp.float32):
        self.in_channels = in_channels
        self.out_channels = out_channels
        self.modes1 = modes1
        self.modes2 = modes2
        self.s1 = s1
        self.s2 = s2
        scale = 1.0 / (in_channels * out_channels)
        k1, k2, k3, k4 = jax.random.split(key, 4)
        shape = (in_channels, out_channels, modes1, modes2)
        # torch.rand(..., dtype=cfloat): real and imag each uniform [0, 1)
        self.weights1 = (scale * (jax.random.uniform(k1, shape)
                                  + 1j * jax.random.uniform(k2, shape))).astype(jnp.complex64)
        self.weights2 = (scale * (jax.random.uniform(k3, shape)
                                  + 1j * jax.random.uniform(k4, shape))).astype(jnp.complex64)

        # Hoisted kernel weight layout: (Cin, Cout, M) real/imag split with the
        # mode axis (x major, y minor) contiguous and last.  `weight_dtype`
        # may be bf16 (HBM-bound v5e/v6e); the kernel upcasts to f32.
        self.M = 2 * modes1 * modes2
        w = jnp.concatenate([self.weights1, self.weights2], axis=2)   # (Ci,Co,2m1,m2)
        w_m = w.reshape(in_channels, out_channels, self.M)
        self.w_re = jnp.real(w_m).astype(weight_dtype)
        self.w_im = jnp.imag(w_m).astype(weight_dtype)

    def __call__(self, u):
        # TODO(synk): the non-uniform-grid path of the reference module
        # (x_in / x_out / iphi -> fft2d / ifft2d) is not implemented; this is
        # the default forward(u) path (x_in=None, x_out=None).
        B, Ci, H, W = u.shape
        m1, m2 = self.modes1, self.modes2
        Co = self.out_channels

        u_ft = jnp.fft.rfft2(u)                      # (B, Ci, H, W//2+1) complex64
        lo = u_ft[:, :, :m1, :m2]
        hi = u_ft[:, :, -m1:, :m2]
        # NOTE: if 2*m1 > H the lo/hi slices overlap — same behavior as the
        # PyTorch module.
        a = jnp.concatenate([lo, hi], axis=2)        # (B, Ci, 2*m1, m2)

        # Real/imag split right after slicing; modes land on the contiguous
        # last axis — no transposes.  (Padding / 4-D folding happens inside
        # spectral_channel_mix and fuses away under jit.)
        a_re = jnp.real(a).reshape(B, Ci, self.M).astype(jnp.float32)
        a_im = jnp.imag(a).reshape(B, Ci, self.M).astype(jnp.float32)

        out_re, out_im = spectral_channel_mix(a_re, a_im, self.w_re, self.w_im)

        out_re = out_re.reshape(B, Co, 2 * m1, m2)
        out_im = out_im.reshape(B, Co, 2 * m1, m2)
        out = (out_re + 1j * out_im).astype(jnp.complex64)           # (B, Co, 2*m1, m2)
        factor1 = out[:, :, :m1, :]
        factor2 = out[:, :, m1:, :]

        out_ft = jnp.zeros((B, Co, H, W // 2 + 1), dtype=jnp.complex64)
        out_ft = out_ft.at[:, :, :m1, :m2].set(factor1)
        out_ft = out_ft.at[:, :, -m1:, :m2].set(factor2)
        return jnp.fft.irfft2(out_ft, s=(H, W))


if __name__ == "__main__":
    key = jax.random.PRNGKey(0)
    ku, kw = jax.random.split(key)
    B, Ci, Co, H, W = 2, 4, 4, 16, 16
    modes1, modes2 = 4, 4

    u = jax.random.normal(ku, (B, Ci, H, W), dtype=jnp.float32)
    layer = SpectralConv2d(Ci, Co, modes1, modes2, key=kw)

    out = jax.block_until_ready(layer(u))

    # Pure-JAX reference for the whole forward (same math, no Pallas).
    u_ft = jnp.fft.rfft2(u)
    f1 = jnp.einsum('bixy,ioxy->boxy', u_ft[:, :, :modes1, :modes2], layer.weights1)
    f2 = jnp.einsum('bixy,ioxy->boxy', u_ft[:, :, -modes1:, :modes2], layer.weights2)
    ref_ft = jnp.zeros((B, Co, H, W // 2 + 1), dtype=jnp.complex64)
    ref_ft = ref_ft.at[:, :, :modes1, :modes2].set(f1)
    ref_ft = ref_ft.at[:, :, -modes1:, :modes2].set(f2)
    ref = jnp.fft.irfft2(ref_ft, s=(H, W))

    assert out.shape == (B, Co, H, W)
    assert jnp.allclose(out, ref, atol=1e-4, rtol=1e-4)
    print("KERNEL_OK")
</pallas_src>

<mosaic_0001>
module attributes {stable_mosaic.version = 11 : i64} {
  func.func @_spectral_mix_kernel(%arg0: i32, %arg1: memref<2x4x1x128xf32, #tpu.memory_space<vmem>>, %arg2: memref<2x4x1x128xf32, #tpu.memory_space<vmem>>, %arg3: memref<4x4x1x128xf32, #tpu.memory_space<vmem>>, %arg4: memref<4x4x1x128xf32, #tpu.memory_space<vmem>>, %arg5: memref<2x4x1x128xf32, #tpu.memory_space<vmem>>, %arg6: memref<2x4x1x128xf32, #tpu.memory_space<vmem>>) attributes {dimension_semantics = [#tpu.dimension_semantics<parallel>], iteration_bounds = array<i64: 1>, scalar_prefetch = 0 : i64, scratch_operands = 0 : i64, tpu.core_type = #tpu.core_type<tc>, window_params = [{transform_indices = @transform_0, window_bounds = array<i64: 2, 4, 1, 128>}, {transform_indices = @transform_1, window_bounds = array<i64: 2, 4, 1, 128>}, {transform_indices = @transform_2, window_bounds = array<i64: 4, 4, 1, 128>}, {transform_indices = @transform_3, window_bounds = array<i64: 4, 4, 1, 128>}, {transform_indices = @transform_4, window_bounds = array<i64: 2, 4, 1, 128>}, {transform_indices = @transform_5, window_bounds = array<i64: 2, 4, 1, 128>}]} {
    %c0 = arith.constant 0 : index
    %c0_0 = arith.constant 0 : index
    %c0_1 = arith.constant 0 : index
    %c0_2 = arith.constant 0 : index
    %0 = vector.load %arg1[%c0, %c0_0, %c0_1, %c0_2] : memref<2x4x1x128xf32, #tpu.memory_space<vmem>>, vector<2x4x1x128xf32>
    %c0_3 = arith.constant 0 : index
    %c0_4 = arith.constant 0 : index
    %c0_5 = arith.constant 0 : index
    %c0_6 = arith.constant 0 : index
    %1 = vector.load %arg2[%c0_3, %c0_4, %c0_5, %c0_6] : memref<2x4x1x128xf32, #tpu.memory_space<vmem>>, vector<2x4x1x128xf32>
    %c0_7 = arith.constant 0 : index
    %c0_8 = arith.constant 0 : index
    %c0_9 = arith.constant 0 : index
    %c0_10 = arith.constant 0 : index
    %2 = vector.load %arg3[%c0_7, %c0_8, %c0_9, %c0_10] : memref<4x4x1x128xf32, #tpu.memory_space<vmem>>, vector<4x4x1x128xf32>
    %c0_11 = arith.constant 0 : index
    %c0_12 = arith.constant 0 : index
    %c0_13 = arith.constant 0 : index
    %c0_14 = arith.constant 0 : index
    %3 = vector.load %arg4[%c0_11, %c0_12, %c0_13, %c0_14] : memref<4x4x1x128xf32, #tpu.memory_space<vmem>>, vector<4x4x1x128xf32>
    %4 = vector.extract_strided_slice %0 {offsets = [0, 0, 0, 0], sizes = [2, 1, 1, 128], strides = [1, 1, 1, 1]} : vector<2x4x1x128xf32> to vector<2x1x1x128xf32>
    %5 = vector.shape_cast %4 : vector<2x1x1x128xf32> to vector<2x1x128xf32>
    %6 = vector.shape_cast %5 : vector<2x1x128xf32> to vector<2x1x1x128xf32>
    %7 = vector.extract_strided_slice %1 {offsets = [0, 0, 0, 0], sizes = [2, 1, 1, 128], strides = [1, 1, 1, 1]} : vector<2x4x1x128xf32> to vector<2x1x1x128xf32>
    %8 = vector.shape_cast %7 : vector<2x1x1x128xf32> to vector<2x1x128xf32>
    %9 = vector.shape_cast %8 : vector<2x1x128xf32> to vector<2x1x1x128xf32>
    %10 = vector.extract_strided_slice %2 {offsets = [0, 0, 0, 0], sizes = [1, 4, 1, 128], strides = [1, 1, 1, 1]} : vector<4x4x1x128xf32> to vector<1x4x1x128xf32>
    %11 = vector.shape_cast %10 : vector<1x4x1x128xf32> to vector<4x1x128xf32>
    %12 = vector.shape_cast %11 : vector<4x1x128xf32> to vector<1x4x1x128xf32>
    %13 = vector.extract_strided_slice %3 {offsets = [0, 0, 0, 0], sizes = [1, 4, 1, 128], strides = [1, 1, 1, 1]} : vector<4x4x1x128xf32> to vector<1x4x1x128xf32>
    %14 = vector.shape_cast %13 : vector<1x4x1x128xf32> to vector<4x1x128xf32>
    %15 = vector.shape_cast %14 : vector<4x1x128xf32> to vector<1x4x1x128xf32>
    %16 = vector.broadcast %6 : vector<2x1x1x128xf32> to vector<2x4x1x128xf32>
    %17 = vector.broadcast %12 : vector<1x4x1x128xf32> to vector<2x4x1x128xf32>
    %18 = arith.mulf %16, %17 : vector<2x4x1x128xf32>
    %19 = vector.broadcast %9 : vector<2x1x1x128xf32> to vector<2x4x1x128xf32>
    %20 = vector.broadcast %15 : vector<1x4x1x128xf32> to vector<2x4x1x128xf32>
    %21 = arith.mulf %19, %20 : vector<2x4x1x128xf32>
    %22 = arith.subf %18, %21 : vector<2x4x1x128xf32>
    %23 = vector.broadcast %6 : vector<2x1x1x128xf32> to vector<2x4x1x128xf32>
    %24 = vector.broadcast %15 : vector<1x4x1x128xf32> to vector<2x4x1x128xf32>
    %25 = arith.mulf %23, %24 : vector<2x4x1x128xf32>
    %26 = vector.broadcast %9 : vector<2x1x1x128xf32> to vector<2x4x1x128xf32>
    %27 = vector.broadcast %12 : vector<1x4x1x128xf32> to vector<2x4x1x128xf32>
    %28 = arith.mulf %26, %27 : vector<2x4x1x128xf32>
    %29 = arith.addf %25, %28 : vector<2x4x1x128xf32>
    %30 = vector.extract_strided_slice %0 {offsets = [0, 1, 0, 0], sizes = [2, 1, 1, 128], strides = [1, 1, 1, 1]} : vector<2x4x1x128xf32> to vector<2x1x1x128xf32>
    %31 = vector.shape_cast %30 : vector<2x1x1x128xf32> to vector<2x1x128xf32>
    %32 = vector.shape_cast %31 : vector<2x1x128xf32> to vector<2x1x1x128xf32>
    %33 = vector.extract_strided_slice %1 {offsets = [0, 1, 0, 0], sizes = [2, 1, 1, 128], strides = [1, 1, 1, 1]} : vector<2x4x1x128xf32> to vector<2x1x1x128xf32>
    %34 = vector.shape_cast %33 : vector<2x1x1x128xf32> to vector<2x1x128xf32>
    %35 = vector.shape_cast %34 : vector<2x1x128xf32> to vector<2x1x1x128xf32>
    %36 = vector.extract_strided_slice %2 {offsets = [1, 0, 0, 0], sizes = [1, 4, 1, 128], strides = [1, 1, 1, 1]} : vector<4x4x1x128xf32> to vector<1x4x1x128xf32>
    %37 = vector.shape_cast %36 : vector<1x4x1x128xf32> to vector<4x1x128xf32>
    %38 = vector.shape_cast %37 : vector<4x1x128xf32> to vector<1x4x1x128xf32>
    %39 = vector.extract_strided_slice %3 {offsets = [1, 0, 0, 0], sizes = [1, 4, 1, 128], strides = [1, 1, 1, 1]} : vector<4x4x1x128xf32> to vector<1x4x1x128xf32>
    %40 = vector.shape_cast %39 : vector<1x4x1x128xf32> to vector<4x1x128xf32>
    %41 = vector.shape_cast %40 : vector<4x1x128xf32> to vector<1x4x1x128xf32>
    %42 = vector.broadcast %32 : vector<2x1x1x128xf32> to vector<2x4x1x128xf32>
    %43 = vector.broadcast %38 : vector<1x4x1x128xf32> to vector<2x4x1x128xf32>
    %44 = arith.mulf %42, %43 : vector<2x4x1x128xf32>
    %45 = vector.broadcast %35 : vector<2x1x1x128xf32> to vector<2x4x1x128xf32>
    %46 = vector.broadcast %41 : vector<1x4x1x128xf32> to vector<2x4x1x128xf32>
    %47 = arith.mulf %45, %46 : vector<2x4x1x128xf32>
    %48 = arith.subf %44, %47 : vector<2x4x1x128xf32>
    %49 = vector.broadcast %32 : vector<2x1x1x128xf32> to vector<2x4x1x128xf32>
    %50 = vector.broadcast %41 : vector<1x4x1x128xf32> to vector<2x4x1x128xf32>
    %51 = arith.mulf %49, %50 : vector<2x4x1x128xf32>
    %52 = vector.broadcast %35 : vector<2x1x1x128xf32> to vector<2x4x1x128xf32>
    %53 = vector.broadcast %38 : vector<1x4x1x128xf32> to vector<2x4x1x128xf32>
    %54 = arith.mulf %52, %53 : vector<2x4x1x128xf32>
    %55 = arith.addf %51, %54 : vector<2x4x1x128xf32>
    %56 = arith.addf %22, %48 : vector<2x4x1x128xf32>
    %57 = arith.addf %29, %55 : vector<2x4x1x128xf32>
    %58 = vector.extract_strided_slice %0 {offsets = [0, 2, 0, 0], sizes = [2, 1, 1, 128], strides = [1, 1, 1, 1]} : vector<2x4x1x128xf32> to vector<2x1x1x128xf32>
    %59 = vector.shape_cast %58 : vector<2x1x1x128xf32> to vector<2x1x128xf32>
    %60 = vector.shape_cast %59 : vector<2x1x128xf32> to vector<2x1x1x128xf32>
    %61 = vector.extract_strided_slice %1 {offsets = [0, 2, 0, 0], sizes = [2, 1, 1, 128], strides = [1, 1, 1, 1]} : vector<2x4x1x128xf32> to vector<2x1x1x128xf32>
    %62 = vector.shape_cast %61 : vector<2x1x1x128xf32> to vector<2x1x128xf32>
    %63 = vector.shape_cast %62 : vector<2x1x128xf32> to vector<2x1x1x128xf32>
    %64 = vector.extract_strided_slice %2 {offsets = [2, 0, 0, 0], sizes = [1, 4, 1, 128], strides = [1, 1, 1, 1]} : vector<4x4x1x128xf32> to vector<1x4x1x128xf32>
    %65 = vector.shape_cast %64 : vector<1x4x1x128xf32> to vector<4x1x128xf32>
    %66 = vector.shape_cast %65 : vector<4x1x128xf32> to vector<1x4x1x128xf32>
    %67 = vector.extract_strided_slice %3 {offsets = [2, 0, 0, 0], sizes = [1, 4, 1, 128], strides = [1, 1, 1, 1]} : vector<4x4x1x128xf32> to vector<1x4x1x128xf32>
    %68 = vector.shape_cast %67 : vector<1x4x1x128xf32> to vector<4x1x128xf32>
    %69 = vector.shape_cast %68 : vector<4x1x128xf32> to vector<1x4x1x128xf32>
    %70 = vector.broadcast %60 : vector<2x1x1x128xf32> to vector<2x4x1x128xf32>
    %71 = vector.broadcast %66 : vector<1x4x1x128xf32> to vector<2x4x1x128xf32>
    %72 = arith.mulf %70, %71 : vector<2x4x1x128xf32>
    %73 = vector.broadcast %63 : vector<2x1x1x128xf32> to vector<2x4x1x128xf32>
    %74 = vector.broadcast %69 : vector<1x4x1x128xf32> to vector<2x4x1x128xf32>
    %75 = arith.mulf %73, %74 : vector<2x4x1x128xf32>
    %76 = arith.subf %72, %75 : vector<2x4x1x128xf32>
    %77 = vector.broadcast %60 : vector<2x1x1x128xf32> to vector<2x4x1x128xf32>
    %78 = vector.broadcast %69 : vector<1x4x1x128xf32> to vector<2x4x1x128xf32>
    %79 = arith.mulf %77, %78 : vector<2x4x1x128xf32>
    %80 = vector.broadcast %63 : vector<2x1x1x128xf32> to vector<2x4x1x128xf32>
    %81 = vector.broadcast %66 : vector<1x4x1x128xf32> to vector<2x4x1x128xf32>
    %82 = arith.mulf %80, %81 : vector<2x4x1x128xf32>
    %83 = arith.addf %79, %82 : vector<2x4x1x128xf32>
    %84 = arith.addf %56, %76 : vector<2x4x1x128xf32>
    %85 = arith.addf %57, %83 : vector<2x4x1x128xf32>
    %86 = vector.extract_strided_slice %0 {offsets = [0, 3, 0, 0], sizes = [2, 1, 1, 128], strides = [1, 1, 1, 1]} : vector<2x4x1x128xf32> to vector<2x1x1x128xf32>
    %87 = vector.shape_cast %86 : vector<2x1x1x128xf32> to vector<2x1x128xf32>
    %88 = vector.shape_cast %87 : vector<2x1x128xf32> to vector<2x1x1x128xf32>
    %89 = vector.extract_strided_slice %1 {offsets = [0, 3, 0, 0], sizes = [2, 1, 1, 128], strides = [1, 1, 1, 1]} : vector<2x4x1x128xf32> to vector<2x1x1x128xf32>
    %90 = vector.shape_cast %89 : vector<2x1x1x128xf32> to vector<2x1x128xf32>
    %91 = vector.shape_cast %90 : vector<2x1x128xf32> to vector<2x1x1x128xf32>
    %92 = vector.extract_strided_slice %2 {offsets = [3, 0, 0, 0], sizes = [1, 4, 1, 128], strides = [1, 1, 1, 1]} : vector<4x4x1x128xf32> to vector<1x4x1x128xf32>
    %93 = vector.shape_cast %92 : vector<1x4x1x128xf32> to vector<4x1x128xf32>
    %94 = vector.shape_cast %93 : vector<4x1x128xf32> to vector<1x4x1x128xf32>
    %95 = vector.extract_strided_slice %3 {offsets = [3, 0, 0, 0], sizes = [1, 4, 1, 128], strides = [1, 1, 1, 1]} : vector<4x4x1x128xf32> to vector<1x4x1x128xf32>
    %96 = vector.shape_cast %95 : vector<1x4x1x128xf32> to vector<4x1x128xf32>
    %97 = vector.shape_cast %96 : vector<4x1x128xf32> to vector<1x4x1x128xf32>
    %98 = vector.broadcast %88 : vector<2x1x1x128xf32> to vector<2x4x1x128xf32>
    %99 = vector.broadcast %94 : vector<1x4x1x128xf32> to vector<2x4x1x128xf32>
    %100 = arith.mulf %98, %99 : vector<2x4x1x128xf32>
    %101 = vector.broadcast %91 : vector<2x1x1x128xf32> to vector<2x4x1x128xf32>
    %102 = vector.broadcast %97 : vector<1x4x1x128xf32> to vector<2x4x1x128xf32>
    %103 = arith.mulf %101, %102 : vector<2x4x1x128xf32>
    %104 = arith.subf %100, %103 : vector<2x4x1x128xf32>
    %105 = vector.broadcast %88 : vector<2x1x1x128xf32> to vector<2x4x1x128xf32>
    %106 = vector.broadcast %97 : vector<1x4x1x128xf32> to vector<2x4x1x128xf32>
    %107 = arith.mulf %105, %106 : vector<2x4x1x128xf32>
    %108 = vector.broadcast %91 : vector<2x1x1x128xf32> to vector<2x4x1x128xf32>
    %109 = vector.broadcast %94 : vector<1x4x1x128xf32> to vector<2x4x1x128xf32>
    %110 = arith.mulf %108, %109 : vector<2x4x1x128xf32>
    %111 = arith.addf %107, %110 : vector<2x4x1x128xf32>
    %112 = arith.addf %84, %104 : vector<2x4x1x128xf32>
    %113 = arith.addf %85, %111 : vector<2x4x1x128xf32>
    %c0_15 = arith.constant 0 : index
    %c0_16 = arith.constant 0 : index
    %c0_17 = arith.constant 0 : index
    %c0_18 = arith.constant 0 : index
    %114 = vector.load %arg5[%c0_15, %c0_16, %c0_17, %c0_18] : memref<2x4x1x128xf32, #tpu.memory_space<vmem>>, vector<2x4x1x128xf32>
    tpu.vector_store %arg5[%c0_15, %c0_16, %c0_17, %c0_18], %112 {strides = array<i32>} : memref<2x4x1x128xf32, #tpu.memory_space<vmem>>, vector<2x4x1x128xf32>,
    %c0_19 = arith.constant 0 : index
    %c0_20 = arith.constant 0 : index
    %c0_21 = arith.constant 0 : index
    %c0_22 = arith.constant 0 : index
    %115 = vector.load %arg6[%c0_19, %c0_20, %c0_21, %c0_22] : memref<2x4x1x128xf32, #tpu.memory_space<vmem>>, vector<2x4x1x128xf32>
    tpu.vector_store %arg6[%c0_19, %c0_20, %c0_21, %c0_22], %113 {strides = array<i32>} : memref<2x4x1x128xf32, #tpu.memory_space<vmem>>, vector<2x4x1x128xf32>,
    return
  }
  func.func @transform_0(%arg0: i32) -> (i32, i32, i32, i32) {
    %c0_i32 = arith.constant 0 : i32
    %c0_i32_0 = arith.constant 0 : i32
    %c0_i32_1 = arith.constant 0 : i32
    %c0_i32_2 = arith.constant 0 : i32
    return %c0_i32, %c0_i32_0, %arg0, %c0_i32_1 : i32, i32, i32, i32
  }
  func.func @transform_1(%arg0: i32) -> (i32, i32, i32, i32) {
    %c0_i32 = arith.constant 0 : i32
    %c0_i32_0 = arith.constant 0 : i32
    %c0_i32_1 = arith.constant 0 : i32
    %c0_i32_2 = arith.constant 0 : i32
    return %c0_i32, %c0_i32_0, %arg0, %c0_i32_1 : i32, i32, i32, i32
  }
  func.func @transform_2(%arg0: i32) -> (i32, i32, i32, i32) {
    %c0_i32 = arith.constant 0 : i32
    %c0_i32_0 = arith.constant 0 : i32
    %c0_i32_1 = arith.constant 0 : i32
    %c0_i32_2 = arith.constant 0 : i32
    return %c0_i32, %c0_i32_0, %arg0, %c0_i32_1 : i32, i32, i32, i32
  }
  func.func @transform_3(%arg0: i32) -> (i32, i32, i32, i32) {
    %c0_i32 = arith.constant 0 : i32
    %c0_i32_0 = arith.constant 0 : i32
    %c0_i32_1 = arith.constant 0 : i32
    %c0_i32_2 = arith.constant 0 : i32
    return %c0_i32, %c0_i32_0, %arg0, %c0_i32_1 : i32, i32, i32, i32
  }
  func.func @transform_4(%arg0: i32) -> (i32, i32, i32, i32) {
    %c0_i32 = arith.constant 0 : i32
    %c0_i32_0 = arith.constant 0 : i32
    %c0_i32_1 = arith.constant 0 : i32
    %c0_i32_2 = arith.constant 0 : i32
    return %c0_i32, %c0_i32_0, %arg0, %c0_i32_1 : i32, i32, i32, i32
  }
  func.func @transform_5(%arg0: i32) -> (i32, i32, i32, i32) {
    %c0_i32 = arith.constant 0 : i32
    %c0_i32_0 = arith.constant 0 : i32
    %c0_i32_1 = arith.constant 0 : i32
    %c0_i32_2 = arith.constant 0 : i32
    return %c0_i32, %c0_i32_0, %arg0, %c0_i32_1 : i32, i32, i32, i32
  }
}

</mosaic_0001>

<bundles_post_ra>
// kernel: tpu_custom_call.1
= control target key start
LH: loop header
LB: loop body
LE: loop exit
PB: predicated region body
PF: predicated region fallthrough
CT: control target
= control target key end

     0   :  { %11 = vsyncpa [#allocation3], 0  ;;  %s1078_s0 = inlined_call_operand.hbm [shape: f32[2,4,1,128], index: 0, kind: input, shape index: {}]   ;;  %s1079_s1 = inlined_call_operand.hbm [shape: f32[2,4,1,128], index: 1, kind: input, shape index: {}]   ;;  %s1080_s2 = inlined_call_operand.hbm [shape: f32[4,4,1,128], index: 2, kind: input, shape index: {}]   ;;  %s1081_s3 = inlined_call_operand.hbm [shape: f32[4,4,1,128], index: 3, kind: input, shape index: {}]   ;;  %s1082_s4 = inlined_call_operand.hbm [shape: f32[2,4,1,128], index: 4, kind: output, shape index: {0}]   ;;  %s1083_s5 = inlined_call_operand.hbm [shape: f32[2,4,1,128], index: 5, kind: output, shape index: {1}]  }
   0x1   :  { %12 = vsyncpa [#allocation6], 0 }
   0x2   :  { %13 = vsyncpa [#allocation9], 0 }
   0x3   :  { %14 = vsyncpa [#allocation4], 0 }
   0x4   :  { %15 = vsyncpa [#allocation12], 0  ;;  %s565_s18 = smov [#allocation5]   ;;  %s566_s20 = smov [#allocation2]  }
   0x5   :  { %s33_s19 = sshll.u32 %s565_s18, 4  ;;  %s21_s21 = sshll.u32 %s566_s20, 4  ;;  %s34_s19 = int_to_ptr.vmem [resolvable:$true] %s33_s19  ;;  %s603_s21 = int_to_ptr.vmem [resolvable:$true] %s21_s21 }
   0x6   :  { %s423_s24 = scalar_lea.hbm %s1079_s1, 128 }
   0x7   :  { %p424_p0 = scmp.ne.s32.totalorder %s1079_s1, %s423_s24  ;;  %p427_p1 = scmp.lt.u32.totalorder %s423_s24, %s1079_s1 }
   0x9   :  { %p429_p2 = pnand %p427_p1, %p424_p0 }
   0xb   :  { %432 = shalt.err (!%p429_p2)
}
   0xc   :  { %s433_s29 = scalar_lea.vmem %s34_s19, 128  ;;  %p438_p4 = scmp.lt.s32.totalorder %s34_s19, %s34_s19 }
   0xd   :  { %p434_p3 = scmp.ne.s32.totalorder %s34_s19, %s433_s29  ;;  %p439_p5 = scmp.lt.s32.totalorder %s433_s29, %s433_s29 }
   0xf   :  { %p440_p6 = por %p439_p5, %p438_p4 }
  0x11   :  { %p441_p7 = pnand %p440_p6, %p434_p3 }
  0x13   :  { %444 = shalt.err (!%p441_p7)
}
  0x14   :  { %s567_s30 = smov 16   ;;  %s568_s6 = smov 1  }
  0x15   :  { %39 = dma.hbm_to_vmem [thread:$0]  %s1079_s1, 128, %s34_s19, [#allocation6], %s567_s30, %s567_s30, %s568_s6  }
  0x16   :  { %s445_s11 = scalar_lea.hbm %s1078_s0, 128 }
  0x17   :  { %p446_p8 = scmp.ne.s32.totalorder %s1078_s0, %s445_s11  ;;  %p449_p9 = scmp.lt.u32.totalorder %s445_s11, %s1078_s0 }
  0x19   :  { %p451_p10 = pnand %p449_p9, %p446_p8 }
  0x1b   :  { %454 = shalt.err (!%p451_p10)
}
  0x1c   :  { %s455_s16 = scalar_lea.vmem %s603_s21, 128  ;;  %p460_p12 = scmp.lt.s32.totalorder %s603_s21, %s603_s21 }
  0x1d   :  { %p456_p11 = scmp.ne.s32.totalorder %s603_s21, %s455_s16  ;;  %p461_p13 = scmp.lt.s32.totalorder %s455_s16, %s455_s16 }
  0x1f   :  { %p462_p0 = por %p461_p13, %p460_p12 }
  0x21   :  { %p463_p1 = pnand %p462_p0, %p456_p11 }
  0x23   :  { %466 = shalt.err (!%p463_p1)
}
  0x24   :  { %27 = dma.hbm_to_vmem [thread:$0]  %s1078_s0, 128, %s603_s21, [#allocation3], %s567_s30, %s567_s30, %s568_s6  }
  0x25   :  { %s569_s18 = smov [#allocation7]   ;;  %s570_s20 = smov [#allocation8]  }
  0x26   :  { %s45_s19 = sshll.u32 %s569_s18, 4  ;;  %s57_s22 = sshll.u32 %s570_s20, 4  ;;  %s46_s19 = int_to_ptr.vmem [resolvable:$true] %s45_s19  ;;  %s640_s22 = int_to_ptr.vmem [resolvable:$true] %s57_s22 }
  0x27   :  { %s467_s25 = scalar_lea.hbm %s1080_s2, 256 }
  0x28   :  { %p468_p2 = scmp.ne.s32.totalorder %s1080_s2, %s467_s25  ;;  %p471_p3 = scmp.lt.u32.totalorder %s467_s25, %s1080_s2 }
  0x2a   :  { %p473_p4 = pnand %p471_p3, %p468_p2 }
  0x2c   :  { %476 = shalt.err (!%p473_p4)
}
  0x2d   :  { %s477_s0 = scalar_lea.vmem %s46_s19, 256  ;;  %p482_p6 = scmp.lt.s32.totalorder %s46_s19, %s46_s19 }
  0x2e   :  { %p478_p5 = scmp.ne.s32.totalorder %s46_s19, %s477_s0  ;;  %p483_p7 = scmp.lt.s32.totalorder %s477_s0, %s477_s0 }
  0x30   :  { %p484_p8 = por %p483_p7, %p482_p6 }
  0x32   :  { %p485_p9 = pnand %p484_p8, %p478_p5 }
  0x34   :  { %488 = shalt.err (!%p485_p9)
}
  0x35   :  { %51 = dma.hbm_to_vmem [thread:$0]  %s1080_s2, 256, %s46_s19, [#allocation6], %s567_s30, %s567_s30, %s568_s6  }
  0x36   :  { %s489_s10 = scalar_lea.hbm %s1081_s3, 256 }
  0x37   :  { %p490_p10 = scmp.ne.s32.totalorder %s1081_s3, %s489_s10  ;;  %p493_p11 = scmp.lt.u32.totalorder %s489_s10, %s1081_s3 }
  0x39   :  { %p495_p12 = pnand %p493_p11, %p490_p10 }
  0x3b   :  { %498 = shalt.err (!%p495_p12)
}
  0x3c   :  { %s499_s15 = scalar_lea.vmem %s640_s22, 256  ;;  %p504_p0 = scmp.lt.s32.totalorder %s640_s22, %s640_s22 }
  0x3d   :  { %p500_p13 = scmp.ne.s32.totalorder %s640_s22, %s499_s15  ;;  %p505_p1 = scmp.lt.s32.totalorder %s499_s15, %s499_s15 }
  0x3f   :  { %p506_p2 = por %p505_p1, %p504_p0 }
  0x41   :  { %p507_p3 = pnand %p506_p2, %p500_p13 }
  0x43   :  { %510 = shalt.err (!%p507_p3)
}
  0x44   :  { %63 = dma.hbm_to_vmem [thread:$0]  %s1081_s3, 256, %s640_s22, [#allocation9], %s567_s30, %s567_s30, %s568_s6  }
  0x45   :  { %555 = dma.done.wait [#allocation3], 128  }
  0x46   :  { %556 = vsyncadd [#allocation3], 4294967168 }
  0x47   :  { %557 = dma.done.wait [#allocation6], 384  }
  0x48   :  { %558 = vsyncadd [#allocation6], 4294966912 }
  0x49   :  { %559 = dma.done.wait [#allocation9], 256  }
  0x4a   :  { %560 = vsyncadd [#allocation9], 4294967040  ;;  %v677_v0 = vld [vmem:[#allocation2] sm:$0x1]  ;;  %v679_v1 = vld [vmem:[#allocation2 + $0x1] sm:$0x1] }
  0x4b   :  { %1100 = vst [vmem:[#allocation18_spill] sm:$0xff] %v677_v0  ;;  %1101 = vst [vmem:[#allocation19_spill] sm:$0xff] %v679_v1  ;;  %v681_v2 = vld [vmem:[#allocation2 + $0x2] sm:$0x1]  ;;  %v683_v3 = vld [vmem:[#allocation2 + $0x3] sm:$0x1] }
  0x4c   :  { %1102 = vst [vmem:[#allocation20_spill] sm:$0xff] %v683_v3  ;;  %v685_v4 = vld [vmem:[#allocation5] sm:$0x1]  ;;  %v687_v5 = vld [vmem:[#allocation5 + $0x1] sm:$0x1]  ;;  %s571_s3 = smov [#allocation10]  }
  0x4d   :  { %1103 = vst [vmem:[#allocation21_spill] sm:$0xff] %v685_v4  ;;  %1104 = vst [vmem:[#allocation22_spill] sm:$0xff] %v687_v5  ;;  %v689_v6 = vld [vmem:[#allocation5 + $0x2] sm:$0x1]  ;;  %v691_v7 = vld [vmem:[#allocation5 + $0x3] sm:$0x1] }
  0x4e   :  { %1105 = vst [vmem:[#allocation23_spill] sm:$0xff] %v691_v7  ;;  %v693_v8 = vld [vmem:[#allocation7] sm:$0x1]  ;;  %v695_v9 = vld [vmem:[#allocation7 + $0x4] sm:$0x1]  ;;  %s385_s1 = sshll.u32 %s571_s3, 4  ;;  %s943_s1 = int_to_ptr.vmem [resolvable:$true] %s385_s1 }
  0x4f   :  { %1106 = vst [vmem:[#allocation24_spill] sm:$0xff] %v693_v8  ;;  %1107 = vst [vmem:[#allocation25_spill] sm:$0xff] %v695_v9  ;;  %v697_v10 = vld [vmem:[#allocation7 + $0x8] sm:$0x1]  ;;  %v699_v11 = vld [vmem:[#allocation7 + $0xc] sm:$0x1]  ;;  %v124_v12 = vmul.f32 %v693_v8, %v677_v0  ;;  %v705_v13 = vmul.f32 %v693_v8, %v685_v4  ;;  %v172_v17 = vmul.f32 %v695_v9, %v679_v1  ;;  %p516_p5 = scmp.lt.s32.totalorder %s943_s1, %s943_s1 }
  0x50   :  { %v707_v14 = vld [vmem:[#allocation8] sm:$0x1]  ;;  %v709_v15 = vld [vmem:[#allocation8 + $0x4] sm:$0x1]  ;;  %v711_v16 = vld [vmem:[#allocation8 + $0x8] sm:$0x1]  ;;  %v236_v18 = vmul.f32 %v697_v10, %v681_v2  ;;  %v300_v19 = vmul.f32 %v699_v11, %v683_v3  ;;  %v721_v20 = vmul.f32 %v695_v9, %v687_v5 }
  0x51   :  { %1108 = vst [vmem:[#allocation26_spill] sm:$0xff] %v707_v14  ;;  %1109 = vst [vmem:[#allocation27_spill] sm:$0xff] %v709_v15  ;;  %v723_v21 = vld [vmem:[#allocation8 + $0xc] sm:$0x1]  ;;  %v132_v22 = vmul.f32 %v707_v14, %v685_v4  ;;  %v180_v23 = vmul.f32 %v709_v15, %v687_v5  ;;  %v244_v24 = vmul.f32 %v711_v16, %v689_v6  ;;  %v731_v25 = vld [vmem:[#allocation7 + $0x1] sm:$0x1] }
  0x52   :  { %v733_v26 = vld [vmem:[#allocation7 + $0x5] sm:$0x1]  ;;  %v737_v27 = vmul.f32 %v707_v14, %v677_v0  ;;  %v308_v28 = vmul.f32 %v723_v21, %v691_v7  ;;  %v741_v29 = vld [vmem:[#allocation7 + $0x9] sm:$0x1]  ;;  %v743_v30 = vld [vmem:[#allocation7 + $0xd] sm:$0x1]  ;;  %v125_v32 = vmul.f32 %v731_v25, %v677_v0  ;;  %v753_v34 = vmul.f32 %v709_v15, %v679_v1 }
  0x53   :  { %v745_v31 = vld [vmem:[#allocation8 + $0x1] sm:$0x1]  ;;  %v173_v33 = vmul.f32 %v733_v26, %v679_v1  ;;  %v140_v35 = vsub.f32 %v124_v12, %v132_v22  ;;  %v188_v36 = vsub.f32 %v172_v17, %v180_v23  ;;  %v252_v37 = vsub.f32 %v236_v18, %v244_v24  ;;  %v755_v38 = vld [vmem:[#allocation8 + $0x5] sm:$0x1]  ;;  %v757_v39 = vld [vmem:[#allocation8 + $0x9] sm:$0x1] }
  0x54   :  { %v759_v40 = vld [vmem:[#allocation8 + $0xd] sm:$0x1]  ;;  %v133_v41 = vmul.f32 %v745_v31, %v685_v4  ;;  %v316_v42 = vsub.f32 %v300_v19, %v308_v28  ;;  %v181_v43 = vmul.f32 %v755_v38, %v687_v5  ;;  %v237_v44 = vmul.f32 %v741_v29, %v681_v2  ;;  %v769_v46 = vld [vmem:[#allocation7 + $0x2] sm:$0x1]  ;;  %v771_v47 = vld [vmem:[#allocation7 + $0x6] sm:$0x1] }
  0x55   :  { %v245_v45 = vmul.f32 %v757_v39, %v689_v6  ;;  %v220_v48 = vadd.f32 %v188_v36, %v140_v35  ;;  %v301_v50 = vmul.f32 %v743_v30, %v683_v3  ;;  %v309_v51 = vmul.f32 %v759_v40, %v691_v7  ;;  %v777_v52 = vld [vmem:[#allocation7 + $0xa] sm:$0x1]  ;;  %v779_v53 = vld [vmem:[#allocation8 + $0x2] sm:$0x1]  ;;  %v781_v54 = vld [vmem:[#allocation8 + $0x6] sm:$0x1] }
  0x56   :  { %v141_v49 = vsub.f32 %v125_v32, %v133_v41  ;;  %v189_v55 = vsub.f32 %v173_v33, %v181_v43  ;;  %v783_v57 = vld [vmem:[#allocation7 + $0xe] sm:$0x1]  ;;  %v785_v58 = vld [vmem:[#allocation8 + $0xa] sm:$0x1]  ;;  %v787_v59 = vld [vmem:[#allocation8 + $0xe] sm:$0x1]  ;;  %v126_v60 = vmul.f32 %v769_v46, %v677_v0  ;;  %v134_v61 = vmul.f32 %v779_v53, %v685_v4 }
  0x57   :  { %v253_v56 = vsub.f32 %v237_v44, %v245_v45  ;;  %v284_v62 = vadd.f32 %v252_v37, %v220_v48  ;;  %v317_v63 = vsub.f32 %v301_v50, %v309_v51  ;;  %v174_v12 = vmul.f32 %v771_v47, %v679_v1  ;;  %v797_v18 = vld [vmem:[#allocation7 + $0x3] sm:$0x1]  ;;  %v803_v28 = vld [vmem:[#allocation7 + $0x7] sm:$0x1]  ;;  %v805_v32 = vld [vmem:[#allocation8 + $0x3] sm:$0x1] }
  0x58   :  { %v182_v17 = vmul.f32 %v781_v54, %v687_v5  ;;  %v221_v19 = vadd.f32 %v189_v55, %v141_v49  ;;  %v142_v22 = vsub.f32 %v126_v60, %v134_v61  ;;  %v238_v23 = vmul.f32 %v777_v52, %v681_v2  ;;  %v807_v33 = vld [vmem:[#allocation8 + $0x7] sm:$0x1]  ;;  %v813_v43 = vld [vmem:[#allocation7 + $0xb] sm:$0x1]  ;;  %v815_v44 = vld [vmem:[#allocation8 + $0xb] sm:$0x1] }
  0x59   :  { %v246_v24 = vmul.f32 %v785_v58, %v689_v6  ;;  %v348_v35 = vadd.f32 %v316_v42, %v284_v62  ;;  %v302_v37 = vmul.f32 %v783_v57, %v683_v3  ;;  %v310_v41 = vmul.f32 %v787_v59, %v691_v7  ;;  %v817_v49 = vld [vmem:[#allocation7 + $0xf] sm:$0x1]  ;;  %v819_v50 = vld [vmem:[#allocation8 + $0xf] sm:$0x1]  ;;  %v829_v62 = vld [vmem:[#allocation2 + $0x4] sm:$0x1] }
  0x5a   :  { %v190_v36 = vsub.f32 %v174_v12, %v182_v17  ;;  %v285_v45 = vadd.f32 %v253_v56, %v221_v19  ;;  %v127_v42 = vmul.f32 %v797_v18, %v677_v0  ;;  %v135_v51 = vmul.f32 %v805_v32, %v685_v4  ;;  %v831_v12 = vld [vmem:[#allocation2 + $0x5] sm:$0x1]  ;;  %v833_v17 = vld [vmem:[#allocation5 + $0x4] sm:$0x1]  ;;  %s511_s17 = scalar_lea.vmem %s943_s1, 128 }
  0x5b   :  { %v254_v48 = vsub.f32 %v238_v23, %v246_v24  ;;  %364 = vst [vmem:[#allocation10] sm:$0x1] %v348_v35  ;;  %v318_v60 = vsub.f32 %v302_v37, %v310_v41  ;;  %v175_v61 = vmul.f32 %v803_v28, %v679_v1  ;;  %v183_v56 = vmul.f32 %v807_v33, %v687_v5  ;;  %v839_v35 = vld [vmem:[#allocation5 + $0x5] sm:$0x1]  ;;  %v845_v1 = vld [vmem:[#allocation2 + $0x6] sm:$0x1]  ;;  %p512_p4 = scmp.ne.s32.totalorder %s943_s1, %s511_s17  ;;  %p517_p6 = scmp.lt.s32.totalorder %s511_s17, %s511_s17 }
  0x5c   :  { %v222_v55 = vadd.f32 %v190_v36, %v142_v22  ;;  %v349_v19 = vadd.f32 %v317_v63, %v285_v45  ;;  %v143_v23 = vsub.f32 %v127_v42, %v135_v51  ;;  %v239_v24 = vmul.f32 %v813_v43, %v681_v2  ;;  %v847_v63 = vld [vmem:[#allocation2 + $0x7] sm:$0x1]  ;;  %v849_v45 = vld [vmem:[#allocation5 + $0x6] sm:$0x1]  ;;  %v851_v51 = vld [vmem:[#allocation5 + $0x7] sm:$0x1] }
  0x5d   :  { %v247_v22 = vmul.f32 %v815_v44, %v689_v6  ;;  %v191_v37 = vsub.f32 %v175_v61, %v183_v56  ;;  %v303_v41 = vmul.f32 %v817_v49, %v683_v3  ;;  %v311_v5 = vmul.f32 %v819_v50, %v691_v7  ;;  %p518_p7 = por %p517_p6, %p516_p5 }
  0x5e   :  { %v286_v36 = vadd.f32 %v254_v48, %v222_v55  ;;  %365 = vst [vmem:[#allocation10 + $0x1] sm:$0x1] %v349_v19  ;;  %v128_v48 = vmul.f32 %v693_v8, %v829_v62  ;;  %v136_v55 = vmul.f32 %v707_v14, %v833_v17  ;;  %v176_v61 = vmul.f32 %v695_v9, %v831_v12 }
  0x5f   :  { %v255_v42 = vsub.f32 %v239_v24, %v247_v22  ;;  %v223_v4 = vadd.f32 %v191_v37, %v143_v23  ;;  %v319_v0 = vsub.f32 %v303_v41, %v311_v5  ;;  %v184_v7 = vmul.f32 %v709_v15, %v839_v35  ;;  %p519_p8 = pnand %p518_p7, %p512_p4 }
  0x60   :  { %v350_v56 = vadd.f32 %v318_v60, %v286_v36  ;;  %v144_v3 = vsub.f32 %v128_v48, %v136_v55  ;;  %v240_v19 = vmul.f32 %v697_v10, %v845_v1  ;;  %v248_v24 = vmul.f32 %v711_v16, %v849_v45 }
  0x61   :  { %v304_v22 = vmul.f32 %v699_v11, %v847_v63  ;;  %v287_v8 = vadd.f32 %v255_v42, %v223_v4  ;;  %v192_v14 = vsub.f32 %v176_v61, %v184_v7  ;;  %v312_v60 = vmul.f32 %v723_v21, %v851_v51 }
  0x62   :  { %366 = vst [vmem:[#allocation10 + $0x2] sm:$0x1] %v350_v56  ;;  %v129_v5 = vmul.f32 %v731_v25, %v829_v62  ;;  %v256_v23 = vsub.f32 %v240_v19, %v248_v24  ;;  %v137_v36 = vmul.f32 %v745_v31, %v833_v17  ;;  %v177_v37 = vmul.f32 %v733_v26, %v831_v12 }
  0x63   :  { %v185_v41 = vmul.f32 %v755_v38, %v839_v35  ;;  %v351_v48 = vadd.f32 %v319_v0, %v287_v8  ;;  %v224_v55 = vadd.f32 %v192_v14, %v144_v3  ;;  %v320_v4 = vsub.f32 %v304_v22, %v312_v60 }
  0x64   :  { %v241_v7 = vmul.f32 %v741_v29, %v845_v1  ;;  %v145_v42 = vsub.f32 %v129_v5, %v137_v36  ;;  %v249_v56 = vmul.f32 %v757_v39, %v849_v45  ;;  %v305_v19 = vmul.f32 %v743_v30, %v847_v63 }
  0x65   :  { %v193_v61 = vsub.f32 %v177_v37, %v185_v41  ;;  %367 = vst [vmem:[#allocation10 + $0x3] sm:$0x1] %v351_v48  ;;  %v288_v24 = vadd.f32 %v256_v23, %v224_v55  ;;  %v313_v9 = vmul.f32 %v759_v40, %v851_v51  ;;  %v130_v0 = vmul.f32 %v769_v46, %v829_v62 }
  0x66   :  { %v138_v3 = vmul.f32 %v779_v53, %v833_v17  ;;  %v257_v14 = vsub.f32 %v241_v7, %v249_v56  ;;  %v178_v22 = vmul.f32 %v771_v47, %v831_v12  ;;  %v186_v60 = vmul.f32 %v781_v54, %v839_v35 }
  0x67   :  { %v225_v8 = vadd.f32 %v193_v61, %v145_v42  ;;  %v352_v5 = vadd.f32 %v320_v4, %v288_v24  ;;  %v321_v36 = vsub.f32 %v305_v19, %v313_v9  ;;  %v242_v37 = vmul.f32 %v777_v52, %v845_v1 }
  0x68   :  { %v146_v23 = vsub.f32 %v130_v0, %v138_v3  ;;  %v194_v48 = vsub.f32 %v178_v22, %v186_v60  ;;  %v250_v55 = vmul.f32 %v785_v58, %v849_v45  ;;  %v306_v7 = vmul.f32 %v783_v57, %v847_v63 }
  0x69   :  { %v289_v41 = vadd.f32 %v257_v14, %v225_v8  ;;  %368 = vst [vmem:[#allocation10 + $0x4] sm:$0x1] %v352_v5  ;;  %v314_v42 = vmul.f32 %v787_v59, %v851_v51  ;;  %v131_v4 = vmul.f32 %v797_v18, %v829_v62  ;;  %v139_v9 = vmul.f32 %v805_v32, %v833_v17 }
  0x6a   :  { %v179_v61 = vmul.f32 %v803_v28, %v831_v12  ;;  %v226_v19 = vadd.f32 %v194_v48, %v146_v23  ;;  %v258_v24 = vsub.f32 %v242_v37, %v250_v55  ;;  %v187_v0 = vmul.f32 %v807_v33, %v839_v35 }
  0x6b   :  { %v353_v56 = vadd.f32 %v321_v36, %v289_v41  ;;  %v322_v3 = vsub.f32 %v306_v7, %v314_v42  ;;  %v147_v8 = vsub.f32 %v131_v4, %v139_v9  ;;  %v243_v14 = vmul.f32 %v813_v43, %v845_v1 }
  0x6c   :  { %v251_v22 = vmul.f32 %v815_v44, %v849_v45  ;;  %v290_v60 = vadd.f32 %v258_v24, %v226_v19  ;;  %v195_v5 = vsub.f32 %v179_v61, %v187_v0  ;;  %v307_v15 = vmul.f32 %v817_v49, %v847_v63  ;;  %v1110_v61 = vld [vmem:[#allocation20_spill] sm:$0xff]  ;;  %v1111_v19 = vld [vmem:[#allocation23_spill] sm:$0xff]  ;;  %v1113_v0 = vld [vmem:[#allocation21_spill] sm:$0xff] }
  0x6d   :  { %369 = vst [vmem:[#allocation10 + $0x5] sm:$0x1] %v353_v56  ;;  %v315_v36 = vmul.f32 %v819_v50, %v851_v51  ;;  %v164_v37 = vadd.f32 %v705_v13, %v737_v27  ;;  %v212_v41 = vadd.f32 %v721_v20, %v753_v34  ;;  %v260_v48 = vmul.f32 %v711_v16, %v681_v2  ;;  %v1112_v13 = vld [vmem:[#allocation18_spill] sm:$0xff] }
  0x6e   :  { %v259_v23 = vsub.f32 %v243_v14, %v251_v22  ;;  %v354_v55 = vadd.f32 %v322_v3, %v290_v60  ;;  %v227_v7 = vadd.f32 %v195_v5, %v147_v8  ;;  %v268_v4 = vmul.f32 %v697_v10, %v689_v6  ;;  %v1114_v3 = vld [vmem:[#allocation19_spill] sm:$0xff]  ;;  %v1115_v22 = vld [vmem:[#allocation22_spill] sm:$0xff] }
  0x6f   :  { %v323_v42 = vsub.f32 %v307_v15, %v315_v36  ;;  %v228_v9 = vadd.f32 %v212_v41, %v164_v37  ;;  %v324_v56 = vmul.f32 %v723_v21, %v1110_v61  ;;  %v332_v24 = vmul.f32 %v699_v11, %v1111_v19 }
  0x70   :  { %v149_v27 = vmul.f32 %v745_v31, %v1112_v13  ;;  %370 = vst [vmem:[#allocation10 + $0x6] sm:$0x1] %v354_v55  ;;  %v291_v20 = vadd.f32 %v259_v23, %v227_v7  ;;  %v276_v34 = vadd.f32 %v268_v4, %v260_v48  ;;  %v157_v15 = vmul.f32 %v731_v25, %v1113_v0 }
  0x71   :  { %v197_v8 = vmul.f32 %v755_v38, %v1114_v3  ;;  %v340_v14 = vadd.f32 %v332_v24, %v324_v56  ;;  %v205_v60 = vmul.f32 %v733_v26, %v1115_v22  ;;  %v261_v5 = vmul.f32 %v757_v39, %v681_v2 }
  0x72   :  { %v269_v36 = vmul.f32 %v741_v29, %v689_v6  ;;  %v355_v37 = vadd.f32 %v323_v42, %v291_v20  ;;  %v292_v41 = vadd.f32 %v276_v34, %v228_v9  ;;  %v165_v23 = vadd.f32 %v157_v15, %v149_v27 }
  0x73   :  { %v325_v48 = vmul.f32 %v759_v40, %v1110_v61  ;;  %v213_v55 = vadd.f32 %v205_v60, %v197_v8  ;;  %v333_v4 = vmul.f32 %v743_v30, %v1111_v19  ;;  %v150_v56 = vmul.f32 %v779_v53, %v1112_v13 }
  0x74   :  { %v277_v7 = vadd.f32 %v269_v36, %v261_v5  ;;  %371 = vst [vmem:[#allocation10 + $0x7] sm:$0x1] %v355_v37  ;;  %v356_v42 = vadd.f32 %v340_v14, %v292_v41  ;;  %v158_v9 = vmul.f32 %v769_v46, %v1113_v0  ;;  %v198_v24 = vmul.f32 %v781_v54, %v1114_v3 }
  0x75   :  { %v206_v27 = vmul.f32 %v771_v47, %v1115_v22  ;;  %v229_v20 = vadd.f32 %v213_v55, %v165_v23  ;;  %v341_v34 = vadd.f32 %v333_v4, %v325_v48  ;;  %v262_v15 = vmul.f32 %v785_v58, %v681_v2 }
  0x76   :  { %v270_v8 = vmul.f32 %v777_v52, %v689_v6 }
  0x77   :  { %522 = shalt.err (!%p519_p8)
}
  0x78   :  { %s523_s20 = scalar_lea.hbm %s1082_s4, 128 }
  0x79   :  { %p524_p9 = scmp.ne.s32.totalorder %s1082_s4, %s523_s20  ;;  %p527_p10 = scmp.lt.u32.totalorder %s523_s20, %s1082_s4 }
  0x7b   :  { %p529_p11 = pnand %p527_p10, %p524_p9 }
  0x7d   :  { %532 = shalt.err (!%p529_p11)
}
  0x7e   :  { %391 = dma.vmem_to_hbm [thread:$0]  %s943_s1, 128, %s1082_s4, [#allocation4], %s567_s30, %s567_s30, %s568_s6   ;;  %372 = vst [vmem:[#allocation11] sm:$0x1] %v356_v42  ;;  %v166_v14 = vadd.f32 %v158_v9, %v150_v56  ;;  %v214_v60 = vadd.f32 %v206_v27, %v198_v24  ;;  %v326_v5 = vmul.f32 %v787_v59, %v1110_v61  ;;  %v334_v36 = vmul.f32 %v783_v57, %v1111_v19 }
  0x7f   :  { %v293_v37 = vadd.f32 %v277_v7, %v229_v20  ;;  %v278_v41 = vadd.f32 %v270_v8, %v262_v15  ;;  %v151_v23 = vmul.f32 %v805_v32, %v1112_v13  ;;  %v159_v48 = vmul.f32 %v797_v18, %v1113_v0  ;;  %v1117_v8 = vld [vmem:[#allocation24_spill] sm:$0xff]  ;;  %s572_s4 = smov [#allocation11]  }
  0x80   :  { %v230_v55 = vadd.f32 %v214_v60, %v166_v14  ;;  %v342_v4 = vadd.f32 %v334_v36, %v326_v5  ;;  %v199_v56 = vmul.f32 %v807_v33, %v1114_v3  ;;  %v207_v42 = vmul.f32 %v803_v28, %v1115_v22  ;;  %v1116_v22 = vld [vmem:[#allocation26_spill] sm:$0xff]  ;;  %s397_s28 = sshll.u32 %s572_s4, 4  ;;  %s398_s28 = int_to_ptr.vmem [resolvable:$true] %s397_s28 }
  0x81   :  { %v357_v9 = vadd.f32 %v341_v34, %v293_v37  ;;  %v167_v24 = vadd.f32 %v159_v48, %v151_v23  ;;  %v263_v7 = vmul.f32 %v815_v44, %v681_v2  ;;  %v271_v27 = vmul.f32 %v813_v43, %v689_v6  ;;  %v1118_v2 = vld [vmem:[#allocation27_spill] sm:$0xff]  ;;  %v1119_v37 = vld [vmem:[#allocation25_spill] sm:$0xff]  ;;  %s533_s29 = scalar_lea.vmem %s398_s28, 128  ;;  %p538_p13 = scmp.lt.s32.totalorder %s398_s28, %s398_s28 }
  0x82   :  { %v294_v13 = vadd.f32 %v278_v41, %v230_v55  ;;  %v215_v20 = vadd.f32 %v207_v42, %v199_v56  ;;  %v327_v0 = vmul.f32 %v819_v50, %v1110_v61  ;;  %v335_v15 = vmul.f32 %v817_v49, %v1111_v19  ;;  %p534_p12 = scmp.ne.s32.totalorder %s398_s28, %s533_s29  ;;  %p539_p0 = scmp.lt.s32.totalorder %s533_s29, %s533_s29 }
  0x83   :  { %373 = vst [vmem:[#allocation11 + $0x1] sm:$0x1] %v357_v9  ;;  %v279_v3 = vadd.f32 %v271_v27, %v263_v7  ;;  %v152_v34 = vmul.f32 %v1116_v22, %v829_v62  ;;  %v160_v14 = vmul.f32 %v1117_v8, %v833_v17  ;;  %v200_v60 = vmul.f32 %v1118_v2, %v831_v12 }
  0x84   :  { %v358_v6 = vadd.f32 %v342_v4, %v294_v13  ;;  %v231_v5 = vadd.f32 %v215_v20, %v167_v24  ;;  %v343_v36 = vadd.f32 %v335_v15, %v327_v0  ;;  %v208_v61 = vmul.f32 %v1119_v37, %v839_v35  ;;  %p540_p1 = por %p539_p0, %p538_p13 }
  0x85   :  { %v168_v41 = vadd.f32 %v160_v14, %v152_v34  ;;  %v264_v19 = vmul.f32 %v711_v16, %v845_v1  ;;  %v272_v23 = vmul.f32 %v697_v10, %v849_v45  ;;  %v328_v48 = vmul.f32 %v723_v21, %v847_v63 }
  0x86   :  { %374 = vst [vmem:[#allocation11 + $0x2] sm:$0x1] %v358_v6  ;;  %v295_v55 = vadd.f32 %v279_v3, %v231_v5  ;;  %v216_v56 = vadd.f32 %v208_v61, %v200_v60  ;;  %v336_v4 = vmul.f32 %v699_v11, %v851_v51  ;;  %v153_v42 = vmul.f32 %v745_v31, %v829_v62  ;;  %p541_p2 = pnand %p540_p1, %p534_p12 }
  0x87   :  { %v280_v9 = vadd.f32 %v272_v23, %v264_v19  ;;  %v161_v24 = vmul.f32 %v731_v25, %v833_v17  ;;  %v201_v16 = vmul.f32 %v755_v38, %v831_v12  ;;  %v209_v10 = vmul.f32 %v733_v26, %v839_v35 }
  0x88   :  { %v359_v21 = vadd.f32 %v343_v36, %v295_v55  ;;  %v232_v7 = vadd.f32 %v216_v56, %v168_v41  ;;  %v344_v27 = vadd.f32 %v336_v4, %v328_v48  ;;  %v265_v13 = vmul.f32 %v757_v39, %v845_v1 }
  0x89   :  { %v169_v11 = vadd.f32 %v161_v24, %v153_v42  ;;  %v217_v20 = vadd.f32 %v209_v10, %v201_v16  ;;  %v273_v31 = vmul.f32 %v741_v29, %v849_v45  ;;  %v329_v25 = vmul.f32 %v759_v40, %v847_v63 }
  0x8a   :  { %375 = vst [vmem:[#allocation11 + $0x3] sm:$0x1] %v359_v21  ;;  %v296_v0 = vadd.f32 %v280_v9, %v232_v7  ;;  %v337_v38 = vmul.f32 %v743_v30, %v851_v51  ;;  %v154_v26 = vmul.f32 %v779_v53, %v829_v62  ;;  %v162_v15 = vmul.f32 %v769_v46, %v833_v17 }
  0x8b   :  { %v233_v39 = vadd.f32 %v217_v20, %v169_v11  ;;  %v281_v3 = vadd.f32 %v273_v31, %v265_v13  ;;  %v202_v22 = vmul.f32 %v781_v54, %v831_v12  ;;  %v210_v29 = vmul.f32 %v771_v47, %v839_v35 }
  0x8c   :  { %v360_v40 = vadd.f32 %v344_v27, %v296_v0  ;;  %v345_v34 = vadd.f32 %v337_v38, %v329_v25  ;;  %v170_v8 = vadd.f32 %v162_v15, %v154_v26  ;;  %v266_v30 = vmul.f32 %v785_v58, %v845_v1 }
  0x8d   :  { %v297_v14 = vadd.f32 %v281_v3, %v233_v39  ;;  %v218_v2 = vadd.f32 %v210_v29, %v202_v22  ;;  %v274_v53 = vmul.f32 %v777_v52, %v849_v45  ;;  %v330_v46 = vmul.f32 %v787_v59, %v847_v63 }
  0x8e   :  { %376 = vst [vmem:[#allocation11 + $0x4] sm:$0x1] %v360_v40  ;;  %v338_v54 = vmul.f32 %v783_v57, %v851_v51  ;;  %v155_v47 = vmul.f32 %v805_v32, %v829_v62  ;;  %v163_v60 = vmul.f32 %v797_v18, %v833_v17  ;;  %v203_v58 = vmul.f32 %v807_v33, %v831_v12 }
  0x8f   :  { %v361_v6 = vadd.f32 %v345_v34, %v297_v14  ;;  %v234_v5 = vadd.f32 %v218_v2, %v170_v8  ;;  %v282_v36 = vadd.f32 %v274_v53, %v266_v30  ;;  %v211_v52 = vmul.f32 %v803_v28, %v839_v35 }
  0x90   :  { %v346_v59 = vadd.f32 %v338_v54, %v330_v46  ;;  %v171_v37 = vadd.f32 %v163_v60, %v155_v47  ;;  %v267_v57 = vmul.f32 %v815_v44, %v845_v1  ;;  %v275_v32 = vmul.f32 %v813_v43, %v849_v45 }
  0x91   :  { %377 = vst [vmem:[#allocation11 + $0x5] sm:$0x1] %v361_v6  ;;  %v298_v62 = vadd.f32 %v282_v36, %v234_v5  ;;  %v219_v18 = vadd.f32 %v211_v52, %v203_v58  ;;  %v331_v33 = vmul.f32 %v819_v50, %v847_v63  ;;  %v339_v12 = vmul.f32 %v817_v49, %v851_v51 }
  0x92   :  { %v283_v17 = vadd.f32 %v275_v32, %v267_v57 }
  0x93   :  { %v362_v61 = vadd.f32 %v346_v59, %v298_v62  ;;  %v235_v28 = vadd.f32 %v219_v18, %v171_v37  ;;  %v347_v35 = vadd.f32 %v339_v12, %v331_v33 }
  0x95   :  { %378 = vst [vmem:[#allocation11 + $0x6] sm:$0x1] %v362_v61  ;;  %v299_v1 = vadd.f32 %v283_v17, %v235_v28 }
  0x97   :  { %v363_v44 = vadd.f32 %v347_v35, %v299_v1 }
  0x99   :  { %379 = vst [vmem:[#allocation11 + $0x7] sm:$0x1] %v363_v44 }
  0x9a   :  { %544 = shalt.err (!%p541_p2)
}
  0x9b   :  { %s545_s7 = scalar_lea.hbm %s1083_s5, 128 }
  0x9c   :  { %p546_p3 = scmp.ne.s32.totalorder %s1083_s5, %s545_s7  ;;  %p549_p4 = scmp.lt.u32.totalorder %s545_s7, %s1083_s5 }
  0x9e   :  { %p551_p5 = pnand %p549_p4, %p546_p3 }
  0xa0   :  { %554 = shalt.err (!%p551_p5)
}
  0xa1   :  { %403 = dma.vmem_to_hbm [thread:$0]  %s398_s28, 128, %s1083_s5, [#allocation12], %s567_s30, %s567_s30, %s568_s6  }
  0xa2   :  { %561 = dma.done.wait [#allocation4], 128  }
  0xa3   :  { %562 = vsyncadd [#allocation4], 4294967168 }
  0xa4   :  { %563 = dma.done.wait [#allocation12], 128  }
  0xa5   :  { %564 = vsyncadd [#allocation12], 4294967168 }
  0xa6   :  { %410 = vsyncpa [#allocation3], 1 }
  0xa7   :  { %411 = vsyncpa [#allocation6], 1 }
  0xa8   :  { %412 = vsyncpa [#allocation9], 1 }
  0xa9   :  { %413 = vsyncpa [#allocation4], 1 }
  0xaa   :  { %414 = vsyncpa [#allocation12], 1 }

</bundles_post_ra>
